<compile_context>
chip_gen: v5e
topology: v5e:2x2
jax: 0.10.0
libtpu: 0.0.40
codegen_flags: <defaults>
</compile_context>

<pallas_src>
import functools

import jax
import jax.numpy as jnp
from jax.experimental import pallas as pl
from jax.experimental.pallas import tpu as pltpu


# ---------------------------------------------------------------------------
# Helpers
# ---------------------------------------------------------------------------
def _ceil_to(v, m):
    return ((v + m - 1) // m) * m


def _largest_divisor_leq(n, cap):
    cap = max(1, min(int(n), int(cap)))
    for d in range(cap, 0, -1):
        if n % d == 0:
            return d
    return 1


def _vmem_limit_bytes():
    """Per-generation VMEM limit: ~55% of physical (v7x 64MiB -> ~35MiB,
    v5e/v6e 128MiB -> ~70MiB), leaving headroom for compiler scratch."""
    cap = 128 * 1024 * 1024
    try:
        info = pltpu.get_tpu_info()
        cap = int(getattr(info, "vmem_capacity_bytes", cap) or cap)
    except Exception:
        pass
    return int(min(cap * 0.55, 96 * 1024 * 1024))


# ---------------------------------------------------------------------------
# Pallas kernels
# ---------------------------------------------------------------------------
def _conv3x3_s2_kernel(x_ref, hal_ref, w_ref, b_ref, o_ref, *,
                       th, wo, wo_pad, c_in):
    """3x3 stride-2 conv of TH output rows as 9 accumulated MXU matmuls.

    x_ref  : (1, TH, 2, W2p, 2*C)  parity-split padded rows t*TH..t*TH+TH-1
    hal_ref: (1, 1, 1, W2p, 2*C)   halo: H-parity-0 row (t+1)*TH
    w_ref  : (9, C, Cout)          tap weights, index kh*3+kw (VMEM-resident)
    b_ref  : (1, Cout)             bias, f32                  (VMEM-resident)
    o_ref  : (1, TH, Wo, Cout)     output rows for this (image, H-tile)
    """
    m = th * wo_pad
    cout = o_ref.shape[-1]

    # kh=2 taps read H-parity-0 rows shifted by +1: main rows 1..TH-1 + halo.
    if th > 1:
        p2 = jnp.concatenate(
            [x_ref[0, 1:, 0, :, :], hal_ref[0, :, 0, :, :]], axis=0)
    else:
        p2 = hal_ref[0, :, 0, :, :]

    acc = None
    for kh in range(3):
        for kw in range(3):
            pw, dw = kw % 2, kw // 2            # W parity (lane offset) / shift
            lane = slice(pw * c_in, (pw + 1) * c_in)
            if kh < 2:                          # kh==H-parity for kh in {0,1}
                xt = x_ref[0, :, kh, dw:dw + wo_pad, lane]   # (TH, Wo_pad, C)
            else:
                xt = p2[:, dw:dw + wo_pad, lane]
            xt = xt.reshape(m, c_in)
            d = jnp.dot(xt, w_ref[kh * 3 + kw],
                        preferred_element_type=jnp.float32)
            acc = d if acc is None else acc + d  # init from 1st tap (no zeros pass)

    # f32 bias epilogue; drop alignment columns in-kernel; cast once on store.
    out = (acc + b_ref[...]).reshape(th, wo_pad, cout)
    o_ref[0] = out[:, :wo, :].astype(o_ref.dtype)


def _avgpool2x2_kernel(x_ref, o_ref, *, c):
    """2x2/stride-2 average pool on a row tile.

    x_ref : (1, TH, 2, Wo, 2*C)  H-parity split, W-parity folded into lanes
    o_ref : (1, TH, Wo, C)
    """
    top = x_ref[0, :, 0, :, :].astype(jnp.float32)   # rows 2*h
    bot = x_ref[0, :, 1, :, :].astype(jnp.float32)   # rows 2*h + 1
    s = top + bot                                    # (TH, Wo, 2C)
    o_ref[0] = ((s[:, :, :c] + s[:, :, c:]) * 0.25).astype(o_ref.dtype)


# ---------------------------------------------------------------------------
# Wrappers
# ---------------------------------------------------------------------------
def _downsample_conv(x_nchw, weight, bias, compute_dtype):
    N, C, H, W = x_nchw.shape
    Cout = weight.shape[0]
    out_dtype = x_nchw.dtype
    isz = jnp.dtype(compute_dtype).itemsize
    osz = jnp.dtype(out_dtype).itemsize

    # torch: F.pad(x, (0,1,0,1)) then 3x3 / stride-2 VALID conv.
    Ho = (H - 2) // 2 + 1
    Wo = (W - 2) // 2 + 1
    pack = {4: 8, 2: 16, 1: 32}.get(isz, 8)      # sublane packing of dtype
    Wo_pad = _ceil_to(Wo, pack)
    H2, W2p = Ho + 1, Wo_pad + 1
    Hpp, Wpp = 2 * H2, 2 * W2p

    # NCHW -> NHWC in compute dtype, zero pad (covers torch pad + alignment),
    # then a *free* row-major reshape: split H parity, fold W parity into lanes.
    x = jnp.transpose(x_nchw.astype(compute_dtype), (0, 2, 3, 1))
    x = jnp.pad(x, ((0, 0), (0, Hpp - H), (0, Wpp - W), (0, 0)))
    x = x.reshape(N, H2, 2, W2p, 2 * C)

    # (Cout, Cin, 3, 3) -> (kh, kw, ci, co) -> (9, C, Cout)
    wmat = jnp.transpose(weight, (2, 3, 1, 0)).reshape(9, C, Cout)
    wmat = wmat.astype(compute_dtype)
    b2d = bias.reshape(1, Cout).astype(jnp.float32)

    # --- byte-based H tile: per-step VMEM independent of the image size ------
    vmem_limit = _vmem_limit_bytes()
    tile_budget = vmem_limit // 2
    w_bytes = 2 * (9 * C * Cout * isz + Cout * 4)
    halo_bytes = 2 * (W2p * 2 * C * isz)
    per_row = (2 * (2 * W2p * 2 * C * isz)          # main input block x2 bufs
               + 2 * (Wo * Cout * osz)              # output block x2 bufs
               + Wo_pad * Cout * 4                  # f32 accumulator
               + 4 * W2p * 2 * C * max(isz, 4))     # tap/plane temporaries
    avail = max(per_row, tile_budget - w_bytes - halo_bytes)
    TH = _largest_divisor_leq(Ho, avail // per_row)
    nT = Ho // TH

    kernel = functools.partial(_conv3x3_s2_kernel, th=TH, wo=Wo,
                               wo_pad=Wo_pad, c_in=C)
    flops = 2 * N * Ho * Wo_pad * 9 * C * Cout
    bytes_accessed = (x.size * isz + 9 * C * Cout * isz + Cout * 4
                      + N * Ho * Wo * Cout * osz)

    out = pl.pallas_call(
        kernel,
        out_shape=jax.ShapeDtypeStruct((N, Ho, Wo, Cout), out_dtype),
        grid=(N, nT),
        in_specs=[
            # main slab: TH output rows worth of parity-split input
            pl.BlockSpec((1, TH, 2, W2p, 2 * C), lambda n, t: (n, t, 0, 0, 0)),
            # halo: single H-parity-0 row (t+1)*TH (block size 1 => element idx)
            pl.BlockSpec((1, 1, 1, W2p, 2 * C),
                         lambda n, t: (n, (t + 1) * TH, 0, 0, 0)),
            # weights & bias: constant index_map -> stay resident in VMEM
            pl.BlockSpec((9, C, Cout), lambda n, t: (0, 0, 0)),
            pl.BlockSpec((1, Cout), lambda n, t: (0, 0)),
        ],
        out_specs=pl.BlockSpec((1, TH, Wo, Cout), lambda n, t: (n, t, 0, 0)),
        compiler_params=pltpu.CompilerParams(
            dimension_semantics=("parallel", "parallel"),
            vmem_limit_bytes=vmem_limit),
        cost_estimate=pl.CostEstimate(flops=int(flops), transcendentals=0,
                                      bytes_accessed=int(bytes_accessed)),
    )(x, x, wmat, b2d)

    return jnp.transpose(out, (0, 3, 1, 2))          # back to NCHW


def _downsample_avgpool(x_nchw):
    N, C, H, W = x_nchw.shape
    Ho, Wo = H // 2, W // 2                          # torch floor behaviour
    dt = x_nchw.dtype
    isz = jnp.dtype(dt).itemsize

    x = jnp.transpose(x_nchw, (0, 2, 3, 1))[:, :2 * Ho, :2 * Wo, :]
    # Free reshape: (N, 2Ho, 2Wo, C) -> (N, Ho, 2, Wo, 2C).
    x = x.reshape(N, Ho, 2, Wo, 2 * C)

    # Byte-based row tile (mem-bound path -> plenty of pipeline steps).
    vmem_limit = _vmem_limit_bytes()
    tile_budget = vmem_limit // 2
    per_row = (2 * (2 * Wo * 2 * C * isz)            # input block x2 bufs
               + 2 * (Wo * C * isz)                  # output block x2 bufs
               + 3 * (Wo * 2 * C * 4))               # f32 temporaries
    TH = _largest_divisor_leq(Ho, max(1, tile_budget // per_row))
    nT = Ho // TH

    kernel = functools.partial(_avgpool2x2_kernel, c=C)
    out = pl.pallas_call(
        kernel,
        out_shape=jax.ShapeDtypeStruct((N, Ho, Wo, C), dt),
        grid=(N, nT),
        in_specs=[pl.BlockSpec((1, TH, 2, Wo, 2 * C),
                               lambda n, t: (n, t, 0, 0, 0))],
        out_specs=pl.BlockSpec((1, TH, Wo, C), lambda n, t: (n, t, 0, 0)),
        compiler_params=pltpu.CompilerParams(
            dimension_semantics=("parallel", "parallel"),
            vmem_limit_bytes=vmem_limit),
    )(x)
    return jnp.transpose(out, (0, 3, 1, 2))          # NCHW


def downsample(x_nchw, weight=None, bias=None, with_conv=True,
               compute_dtype=jnp.bfloat16):
    """Equivalent of Downsample.forward (NCHW in / NCHW out, output in input
    dtype).  compute_dtype=bf16 (default) trades a little precision for MXU
    throughput and halved HBM input traffic; pass jnp.float32 for exactness."""
    if with_conv:
        return _downsample_conv(x_nchw, weight, bias, compute_dtype)
    return _downsample_avgpool(x_nchw)


# ---------------------------------------------------------------------------
# Demo / correctness check
# ---------------------------------------------------------------------------
if __name__ == "__main__":
    key = jax.random.PRNGKey(0)
    kx, kw, kb = jax.random.split(key, 3)

    N, C, H, W = 2, 4, 16, 16
    x = jax.random.normal(kx, (N, C, H, W), jnp.float32)

    fan_in = C * 3 * 3
    bound = 1.0 / (fan_in ** 0.5)
    weight = jax.random.uniform(kw, (C, C, 3, 3), jnp.float32, -bound, bound)
    bias = jax.random.uniform(kb, (C,), jnp.float32, -bound, bound)

    ref = jax.lax.conv_general_dilated(
        jnp.pad(x, ((0, 0), (0, 0), (0, 1), (0, 1))), weight,
        window_strides=(2, 2), padding="VALID",
        dimension_numbers=("NCHW", "OIHW", "NCHW"),
        precision=jax.lax.Precision.HIGHEST) + bias[None, :, None, None]

    # with_conv=True, f32 compute: strict check of the algorithm
    y32 = jax.block_until_ready(
        downsample(x, weight, bias, with_conv=True, compute_dtype=jnp.float32))
    assert y32.shape == (N, C, H // 2, W // 2), y32.shape
    assert jnp.allclose(y32, ref, atol=2e-3, rtol=2e-3)

    # with_conv=True, default bf16 MXU inputs / f32 accumulation
    ybf = jax.block_until_ready(downsample(x, weight, bias, with_conv=True))
    assert ybf.shape == (N, C, H // 2, W // 2), ybf.shape
    assert jnp.allclose(ybf, ref, atol=7e-2, rtol=7e-2)

    # with_conv=False (avg pool path)
    y2 = jax.block_until_ready(downsample(x, with_conv=False))
    ref2 = x.reshape(N, C, H // 2, 2, W // 2, 2).mean(axis=(3, 5))
    assert y2.shape == (N, C, H // 2, W // 2), y2.shape
    assert jnp.allclose(y2, ref2, atol=1e-5, rtol=1e-5)

    print("KERNEL_OK")
</pallas_src>

<mosaic_0001>
module attributes {stable_mosaic.version = 11 : i64} {
  func.func @_conv3x3_s2_kernel(%arg0: i32, %arg1: i32, %arg2: memref<1x8x2x9x8xf32, #tpu.memory_space<vmem>>, %arg3: memref<1x1x1x9x8xf32, #tpu.memory_space<vmem>>, %arg4: memref<9x4x4xf32, #tpu.memory_space<vmem>>, %arg5: memref<1x4xf32, #tpu.memory_space<vmem>>, %arg6: memref<1x8x8x4xf32, #tpu.memory_space<vmem>>) attributes {dimension_semantics = [#tpu.dimension_semantics<parallel>, #tpu.dimension_semantics<parallel>], iteration_bounds = array<i64: 2, 1>, scalar_prefetch = 0 : i64, scratch_operands = 0 : i64, tpu.core_type = #tpu.core_type<tc>, window_params = [{transform_indices = @transform_0, window_bounds = array<i64: 1, 8, 2, 9, 8>}, {transform_indices = @transform_1, window_bounds = array<i64: 1, 1, 1, 9, 8>}, {pipeline_mode = #tpu.pipeline_mode<synchronous>, transform_indices = @transform_2, window_bounds = array<i64: 9, 4, 4>}, {pipeline_mode = #tpu.pipeline_mode<synchronous>, transform_indices = @transform_3, window_bounds = array<i64: 1, 4>}, {transform_indices = @transform_4, window_bounds = array<i64: 1, 8, 8, 4>}]} {
    %c0 = arith.constant 0 : index
    %c1 = arith.constant 1 : index
    %c0_0 = arith.constant 0 : index
    %c0_1 = arith.constant 0 : index
    %c0_2 = arith.constant 0 : index
    %0 = vector.load %arg2[%c0, %c1, %c0_0, %c0_1, %c0_2] : memref<1x8x2x9x8xf32, #tpu.memory_space<vmem>>, vector<1x7x1x9x8xf32>
    %1 = vector.shape_cast %0 : vector<1x7x1x9x8xf32> to vector<7x9x8xf32>
    %c0_3 = arith.constant 0 : index
    %c0_4 = arith.constant 0 : index
    %c0_5 = arith.constant 0 : index
    %c0_6 = arith.constant 0 : index
    %c0_7 = arith.constant 0 : index
    %2 = vector.load %arg3[%c0_3, %c0_4, %c0_5, %c0_6, %c0_7] : memref<1x1x1x9x8xf32, #tpu.memory_space<vmem>>, vector<1x1x1x9x8xf32>
    %3 = vector.shape_cast %2 : vector<1x1x1x9x8xf32> to vector<1x9x8xf32>
    %4 = tpu.concatenate %1, %3 in 0 : vector<7x9x8xf32>, vector<1x9x8xf32> -> vector<8x9x8xf32>
    %c0_8 = arith.constant 0 : index
    %c0_9 = arith.constant 0 : index
    %c0_10 = arith.constant 0 : index
    %c0_11 = arith.constant 0 : index
    %c0_12 = arith.constant 0 : index
    %5 = vector.load %arg2[%c0_8, %c0_9, %c0_10, %c0_11, %c0_12] : memref<1x8x2x9x8xf32, #tpu.memory_space<vmem>>, vector<1x8x1x8x4xf32>
    %6 = vector.shape_cast %5 : vector<1x8x1x8x4xf32> to vector<8x8x4xf32>
    %7 = vector.shape_cast %6 : vector<8x8x4xf32> to vector<64x4xf32>
    %c0_13 = arith.constant 0 : index
    %c0_14 = arith.constant 0 : index
    %c0_15 = arith.constant 0 : index
    %8 = vector.load %arg4[%c0_13, %c0_14, %c0_15] : memref<9x4x4xf32, #tpu.memory_space<vmem>>, vector<1x4x4xf32>
    %9 = vector.shape_cast %8 : vector<1x4x4xf32> to vector<4x4xf32>
    %cst = arith.constant dense<0.000000e+00> : vector<64x4xf32>
    %10 = tpu.matmul %7, %9, %cst {dimension_numbers = #tpu.dot_dimension_numbers<[1], [0], [0], [1], [0, 0, 1, 1], [], []>} : vector<64x4xf32>, vector<4x4xf32>, vector<64x4xf32> -> vector<64x4xf32>
    %c0_16 = arith.constant 0 : index
    %c0_17 = arith.constant 0 : index
    %c0_18 = arith.constant 0 : index
    %c0_19 = arith.constant 0 : index
    %c4 = arith.constant 4 : index
    %11 = vector.load %arg2[%c0_16, %c0_17, %c0_18, %c0_19, %c4] : memref<1x8x2x9x8xf32, #tpu.memory_space<vmem>>, vector<1x8x1x8x4xf32>
    %12 = vector.shape_cast %11 : vector<1x8x1x8x4xf32> to vector<8x8x4xf32>
    %13 = vector.shape_cast %12 : vector<8x8x4xf32> to vector<64x4xf32>
    %c1_20 = arith.constant 1 : index
    %c0_21 = arith.constant 0 : index
    %c0_22 = arith.constant 0 : index
    %14 = vector.load %arg4[%c1_20, %c0_21, %c0_22] : memref<9x4x4xf32, #tpu.memory_space<vmem>>, vector<1x4x4xf32>
    %15 = vector.shape_cast %14 : vector<1x4x4xf32> to vector<4x4xf32>
    %cst_23 = arith.constant dense<0.000000e+00> : vector<64x4xf32>
    %16 = tpu.matmul %13, %15, %cst_23 {dimension_numbers = #tpu.dot_dimension_numbers<[1], [0], [0], [1], [0, 0, 1, 1], [], []>} : vector<64x4xf32>, vector<4x4xf32>, vector<64x4xf32> -> vector<64x4xf32>
    %17 = arith.addf %10, %16 : vector<64x4xf32>
    %c0_24 = arith.constant 0 : index
    %c0_25 = arith.constant 0 : index
    %c0_26 = arith.constant 0 : index
    %c1_27 = arith.constant 1 : index
    %c0_28 = arith.constant 0 : index
    %18 = vector.load %arg2[%c0_24, %c0_25, %c0_26, %c1_27, %c0_28] : memref<1x8x2x9x8xf32, #tpu.memory_space<vmem>>, vector<1x8x1x8x4xf32>
    %19 = vector.shape_cast %18 : vector<1x8x1x8x4xf32> to vector<8x8x4xf32>
    %20 = vector.shape_cast %19 : vector<8x8x4xf32> to vector<64x4xf32>
    %c2 = arith.constant 2 : index
    %c0_29 = arith.constant 0 : index
    %c0_30 = arith.constant 0 : index
    %21 = vector.load %arg4[%c2, %c0_29, %c0_30] : memref<9x4x4xf32, #tpu.memory_space<vmem>>, vector<1x4x4xf32>
    %22 = vector.shape_cast %21 : vector<1x4x4xf32> to vector<4x4xf32>
    %cst_31 = arith.constant dense<0.000000e+00> : vector<64x4xf32>
    %23 = tpu.matmul %20, %22, %cst_31 {dimension_numbers = #tpu.dot_dimension_numbers<[1], [0], [0], [1], [0, 0, 1, 1], [], []>} : vector<64x4xf32>, vector<4x4xf32>, vector<64x4xf32> -> vector<64x4xf32>
    %24 = arith.addf %17, %23 : vector<64x4xf32>
    %c0_32 = arith.constant 0 : index
    %c0_33 = arith.constant 0 : index
    %c1_34 = arith.constant 1 : index
    %c0_35 = arith.constant 0 : index
    %c0_36 = arith.constant 0 : index
    %25 = vector.load %arg2[%c0_32, %c0_33, %c1_34, %c0_35, %c0_36] : memref<1x8x2x9x8xf32, #tpu.memory_space<vmem>>, vector<1x8x1x8x4xf32>
    %26 = vector.shape_cast %25 : vector<1x8x1x8x4xf32> to vector<8x8x4xf32>
    %27 = vector.shape_cast %26 : vector<8x8x4xf32> to vector<64x4xf32>
    %c3 = arith.constant 3 : index
    %c0_37 = arith.constant 0 : index
    %c0_38 = arith.constant 0 : index
    %28 = vector.load %arg4[%c3, %c0_37, %c0_38] : memref<9x4x4xf32, #tpu.memory_space<vmem>>, vector<1x4x4xf32>
    %29 = vector.shape_cast %28 : vector<1x4x4xf32> to vector<4x4xf32>
    %cst_39 = arith.constant dense<0.000000e+00> : vector<64x4xf32>
    %30 = tpu.matmul %27, %29, %cst_39 {dimension_numbers = #tpu.dot_dimension_numbers<[1], [0], [0], [1], [0, 0, 1, 1], [], []>} : vector<64x4xf32>, vector<4x4xf32>, vector<64x4xf32> -> vector<64x4xf32>
    %31 = arith.addf %24, %30 : vector<64x4xf32>
    %c0_40 = arith.constant 0 : index
    %c0_41 = arith.constant 0 : index
    %c1_42 = arith.constant 1 : index
    %c0_43 = arith.constant 0 : index
    %c4_44 = arith.constant 4 : index
    %32 = vector.load %arg2[%c0_40, %c0_41, %c1_42, %c0_43, %c4_44] : memref<1x8x2x9x8xf32, #tpu.memory_space<vmem>>, vector<1x8x1x8x4xf32>
    %33 = vector.shape_cast %32 : vector<1x8x1x8x4xf32> to vector<8x8x4xf32>
    %34 = vector.shape_cast %33 : vector<8x8x4xf32> to vector<64x4xf32>
    %c4_45 = arith.constant 4 : index
    %c0_46 = arith.constant 0 : index
    %c0_47 = arith.constant 0 : index
    %35 = vector.load %arg4[%c4_45, %c0_46, %c0_47] : memref<9x4x4xf32, #tpu.memory_space<vmem>>, vector<1x4x4xf32>
    %36 = vector.shape_cast %35 : vector<1x4x4xf32> to vector<4x4xf32>
    %cst_48 = arith.constant dense<0.000000e+00> : vector<64x4xf32>
    %37 = tpu.matmul %34, %36, %cst_48 {dimension_numbers = #tpu.dot_dimension_numbers<[1], [0], [0], [1], [0, 0, 1, 1], [], []>} : vector<64x4xf32>, vector<4x4xf32>, vector<64x4xf32> -> vector<64x4xf32>
    %38 = arith.addf %31, %37 : vector<64x4xf32>
    %c0_49 = arith.constant 0 : index
    %c0_50 = arith.constant 0 : index
    %c1_51 = arith.constant 1 : index
    %c1_52 = arith.constant 1 : index
    %c0_53 = arith.constant 0 : index
    %39 = vector.load %arg2[%c0_49, %c0_50, %c1_51, %c1_52, %c0_53] : memref<1x8x2x9x8xf32, #tpu.memory_space<vmem>>, vector<1x8x1x8x4xf32>
    %40 = vector.shape_cast %39 : vector<1x8x1x8x4xf32> to vector<8x8x4xf32>
    %41 = vector.shape_cast %40 : vector<8x8x4xf32> to vector<64x4xf32>
    %c5 = arith.constant 5 : index
    %c0_54 = arith.constant 0 : index
    %c0_55 = arith.constant 0 : index
    %42 = vector.load %arg4[%c5, %c0_54, %c0_55] : memref<9x4x4xf32, #tpu.memory_space<vmem>>, vector<1x4x4xf32>
    %43 = vector.shape_cast %42 : vector<1x4x4xf32> to vector<4x4xf32>
    %cst_56 = arith.constant dense<0.000000e+00> : vector<64x4xf32>
    %44 = tpu.matmul %41, %43, %cst_56 {dimension_numbers = #tpu.dot_dimension_numbers<[1], [0], [0], [1], [0, 0, 1, 1], [], []>} : vector<64x4xf32>, vector<4x4xf32>, vector<64x4xf32> -> vector<64x4xf32>
    %45 = arith.addf %38, %44 : vector<64x4xf32>
    %46 = vector.extract_strided_slice %4 {offsets = [0, 0, 0], sizes = [8, 8, 4], strides = [1, 1, 1]} : vector<8x9x8xf32> to vector<8x8x4xf32>
    %47 = vector.shape_cast %46 : vector<8x8x4xf32> to vector<64x4xf32>
    %c6 = arith.constant 6 : index
    %c0_57 = arith.constant 0 : index
    %c0_58 = arith.constant 0 : index
    %48 = vector.load %arg4[%c6, %c0_57, %c0_58] : memref<9x4x4xf32, #tpu.memory_space<vmem>>, vector<1x4x4xf32>
    %49 = vector.shape_cast %48 : vector<1x4x4xf32> to vector<4x4xf32>
    %cst_59 = arith.constant dense<0.000000e+00> : vector<64x4xf32>
    %50 = tpu.matmul %47, %49, %cst_59 {dimension_numbers = #tpu.dot_dimension_numbers<[1], [0], [0], [1], [0, 0, 1, 1], [], []>} : vector<64x4xf32>, vector<4x4xf32>, vector<64x4xf32> -> vector<64x4xf32>
    %51 = arith.addf %45, %50 : vector<64x4xf32>
    %52 = vector.extract_strided_slice %4 {offsets = [0, 0, 4], sizes = [8, 8, 4], strides = [1, 1, 1]} : vector<8x9x8xf32> to vector<8x8x4xf32>
    %53 = vector.shape_cast %52 : vector<8x8x4xf32> to vector<64x4xf32>
    %c7 = arith.constant 7 : index
    %c0_60 = arith.constant 0 : index
    %c0_61 = arith.constant 0 : index
    %54 = vector.load %arg4[%c7, %c0_60, %c0_61] : memref<9x4x4xf32, #tpu.memory_space<vmem>>, vector<1x4x4xf32>
    %55 = vector.shape_cast %54 : vector<1x4x4xf32> to vector<4x4xf32>
    %cst_62 = arith.constant dense<0.000000e+00> : vector<64x4xf32>
    %56 = tpu.matmul %53, %55, %cst_62 {dimension_numbers = #tpu.dot_dimension_numbers<[1], [0], [0], [1], [0, 0, 1, 1], [], []>} : vector<64x4xf32>, vector<4x4xf32>, vector<64x4xf32> -> vector<64x4xf32>
    %57 = arith.addf %51, %56 : vector<64x4xf32>
    %58 = vector.extract_strided_slice %4 {offsets = [0, 1, 0], sizes = [8, 8, 4], strides = [1, 1, 1]} : vector<8x9x8xf32> to vector<8x8x4xf32>
    %59 = vector.shape_cast %58 : vector<8x8x4xf32> to vector<64x4xf32>
    %c8 = arith.constant 8 : index
    %c0_63 = arith.constant 0 : index
    %c0_64 = arith.constant 0 : index
    %60 = vector.load %arg4[%c8, %c0_63, %c0_64] : memref<9x4x4xf32, #tpu.memory_space<vmem>>, vector<1x4x4xf32>
    %61 = vector.shape_cast %60 : vector<1x4x4xf32> to vector<4x4xf32>
    %cst_65 = arith.constant dense<0.000000e+00> : vector<64x4xf32>
    %62 = tpu.matmul %59, %61, %cst_65 {dimension_numbers = #tpu.dot_dimension_numbers<[1], [0], [0], [1], [0, 0, 1, 1], [], []>} : vector<64x4xf32>, vector<4x4xf32>, vector<64x4xf32> -> vector<64x4xf32>
    %63 = arith.addf %57, %62 : vector<64x4xf32>
    %c0_66 = arith.constant 0 : index
    %c0_67 = arith.constant 0 : index
    %64 = vector.load %arg5[%c0_66, %c0_67] : memref<1x4xf32, #tpu.memory_space<vmem>>, vector<1x4xf32>
    %65 = vector.broadcast %64 : vector<1x4xf32> to vector<64x4xf32>
    %66 = arith.addf %63, %65 : vector<64x4xf32>
    %67 = vector.shape_cast %66 : vector<64x4xf32> to vector<8x8x4xf32>
    %c0_68 = arith.constant 0 : index
    %c0_69 = arith.constant 0 : index
    %c0_70 = arith.constant 0 : index
    %c0_71 = arith.constant 0 : index
    %68 = vector.load %arg6[%c0_68, %c0_69, %c0_70, %c0_71] : memref<1x8x8x4xf32, #tpu.memory_space<vmem>>, vector<1x8x8x4xf32>
    %69 = vector.shape_cast %68 : vector<1x8x8x4xf32> to vector<8x8x4xf32>
    %70 = vector.shape_cast %67 : vector<8x8x4xf32> to vector<1x8x8x4xf32>
    tpu.vector_store %arg6[%c0_68, %c0_69, %c0_70, %c0_71], %70 {strides = array<i32>} : memref<1x8x8x4xf32, #tpu.memory_space<vmem>>, vector<1x8x8x4xf32>,
    return
  }
  func.func @transform_0(%arg0: i32, %arg1: i32) -> (i32, i32, i32, i32, i32) {
    %c0_i32 = arith.constant 0 : i32
    %c0_i32_0 = arith.constant 0 : i32
    %c0_i32_1 = arith.constant 0 : i32
    %c0_i32_2 = arith.constant 0 : i32
    return %arg0, %arg1, %c0_i32, %c0_i32_0, %c0_i32_1 : i32, i32, i32, i32, i32
  }
  func.func @transform_1(%arg0: i32, %arg1: i32) -> (i32, i32, i32, i32, i32) {
    %c1_i32 = arith.constant 1 : i32
    %0 = arith.addi %arg1, %c1_i32 : i32
    %c8_i32 = arith.constant 8 : i32
    %1 = arith.muli %0, %c8_i32 : i32
    %c0_i32 = arith.constant 0 : i32
    %c0_i32_0 = arith.constant 0 : i32
    %c0_i32_1 = arith.constant 0 : i32
    %c0_i32_2 = arith.constant 0 : i32
    return %arg0, %1, %c0_i32, %c0_i32_0, %c0_i32_1 : i32, i32, i32, i32, i32
  }
  func.func @transform_2(%arg0: i32, %arg1: i32) -> (i32, i32, i32) {
    %c0_i32 = arith.constant 0 : i32
    %c0_i32_0 = arith.constant 0 : i32
    %c0_i32_1 = arith.constant 0 : i32
    %c0_i32_2 = arith.constant 0 : i32
    return %c0_i32, %c0_i32_0, %c0_i32_1 : i32, i32, i32
  }
  func.func @transform_3(%arg0: i32, %arg1: i32) -> (i32, i32) {
    %c0_i32 = arith.constant 0 : i32
    %c0_i32_0 = arith.constant 0 : i32
    %c0_i32_1 = arith.constant 0 : i32
    return %c0_i32, %c0_i32_0 : i32, i32
  }
  func.func @transform_4(%arg0: i32, %arg1: i32) -> (i32, i32, i32, i32) {
    %c0_i32 = arith.constant 0 : i32
    %c0_i32_0 = arith.constant 0 : i32
    %c0_i32_1 = arith.constant 0 : i32
    return %arg0, %arg1, %c0_i32, %c0_i32_0 : i32, i32, i32, i32
  }
}

</mosaic_0001>

<bundles_post_ra>
// kernel: tpu_custom_call.1
= control target key start
LH: loop header
LB: loop body
LE: loop exit
PB: predicated region body
PF: predicated region fallthrough
CT: control target
= control target key end

     0   :  { %s1450_s15 = smov 0   ;;  %s1452_s16 = smov 0   ;;  %s1869_s0 = inlined_call_operand.vmem [shape: f32[2,9,2,9,8], index: 0, kind: input, shape index: {}]   ;;  %s1870_s1 = inlined_call_operand.vmem [shape: f32[2,9,2,9,8], index: 1, kind: input, shape index: {}]   ;;  %s1871_s2 = inlined_call_operand.vmem [shape: f32[9,4,4], index: 2, kind: input, shape index: {}]   ;;  %s1872_s3 = inlined_call_operand.vmem [shape: f32[1,4], index: 3, kind: input, shape index: {}]   ;;  %s1873_s4 = inlined_call_operand.vmem [shape: f32[2,8,8,4], index: 4, kind: output, shape index: {}]  }
   0x1   :  { %s1454_s17 = smov 0  }
   0x2 LB: > { %s26_s18 = sadd.s32 1, %s1418_s16  ;;  %p1239_p0 = scmp.ge.s32.totalorder %s1422_s17, 1  ;;  %s1422_s17 = sphi %s1454_s17, %s14_s17   ;;  %s1418_s16 = sphi %s1452_s16, %s1875_s16   ;;  %s1414_s15 = sphi %s1450_s15, %s1874_s15  }
   0x3   : > { %p28_p1 = scmp.ge.s32.totalorder %s26_s18, 2  ;;  %p220_p2 = scmp.lt.s32.totalorder %s1422_s17, 3 }
   0x5   : > { %s1877_s18 = smov (%p28_p1, %s26_s18), 0  ;;  %p221_p3 = pnand %p1239_p0, %p220_p2 }
   0x6   : > { %p279_p4 = scmp.lt.s32.totalorder (!%p221_p3), %s1414_s15, 1  ;;  %s1424_s23 = smov (!%p221_p3), 124  }
   0x7   : > { %224 = sbr.rel (%p221_p3) target bundleno = 415 (0x19f), region = 36 }
   0xc   : > { %s1879_s15 = smov (!%p279_p4, %s1414_s15), 1  ;;  %v1258_v9 = vld [vmem:[%s1871_s2 + $0x4] sm:$0xf]  ;;  %vm387_vm0 = vcmask 1043456   ;;  %v1277_v17 = vld [vmem:[%s1871_s2 + $0x8] sm:$0xf] }
   0xd   : > { %s1371_s19 = smul.u32 288, %s1879_s15  ;;  %1369 = vmatpush.msk.msra.mxu2 %vm387_vm0, %v1258_v9  ;;  %1368 = vmatpush.msk.msra.mxu1 %vm387_vm0, %v1258_v9  ;;  %v1295_v18 = vld [vmem:[%s1871_s2 + $0xc] sm:$0xf]  ;;  %v343_v19 = vld [vmem:[%s1871_s2] sm:$0xf]  ;;  %vm370_vm1 = vcmask 31744  }
   0xe   : > { %1259 = vmatpush.msk.msra.mxu0 %vm387_vm0, %v1258_v9  ;;  %1370 = vmatpush.msk.msra.mxu3 %vm387_vm0, %v1258_v9  ;;  %v1305_v21 = vld [vmem:[%s1871_s2 + $0x10] sm:$0xf]  ;;  %v1333_v22 = vld [vmem:[%s1871_s2 + $0x18] sm:$0xf]  ;;  %v1323_v23 = vld [vmem:[%s1871_s2 + $0x14] sm:$0xf] }
   0xf   : > { %s1476_s22 = scalar_lea.vmem %s1869_s0, %s1371_s19  ;;  %1278 = vmatpush.msk.msrb.mxu2 %vm387_vm0, %v1277_v17  ;;  %1268 = vmatpush.msk.msrb.mxu1 %vm387_vm0, %v343_v19  ;;  %v1353_v26 = vld [vmem:[%s1871_s2 + $0x20] sm:$0xf]  ;;  %v1343_v27 = vld [vmem:[%s1871_s2 + $0x1c] sm:$0xf]  ;;  %s1366_s21 = sadd.s32 256, %s1371_s19  ;;  %vm1009_vm2 = vcmask 1046528  }
  0x10   : > { %v1479_v0 = vld [vmem:[%s1476_s22 + $0x80] sm:$0xff]  ;;  %v1515_v8 = vld [vmem:[%s1476_s22 + $0x10] sm:$0xff]  ;;  %1296 = vmatpush.msk.msrb.mxu3 %vm387_vm0, %v1295_v18  ;;  %1306 = vmatpush.msk.msrb.mxu0 %vm387_vm0, %v1305_v21  ;;  %s1622_s26 = scalar_lea.vmem %s1870_s1, %s1366_s21  ;;  %v1245_v50 = vld [vmem:[%s1476_s22 + $0x28] sm:$0x1]  ;;  %s1367_s19 = sshll.u32 %s1879_s15, 6 }
  0x11   : > { %v1482_v1 = vld [vmem:[%s1476_s22 + $0x40] sm:$0xff]  ;;  %362 = vrot.lane.b32.xlu0 %v1479_v0, %s1424_s23  ;;  %v1531_v10 = vld [vmem:[%s1476_s22 + $0x30] sm:$0xff]  ;;  %v1011_v52 = vrot.slane %v1245_v50, 1  ;;  %v1247_v56 = vld [vmem:[%s1476_s22 + $0x48] sm:$0x1]  ;;  %s1813_s29 = scalar_lea.vmem %s1873_s4, %s1367_s19 }
  0x12   : > { %358 = vrot.lane.b32.xlu1 %v1482_v1, %s1424_s23  ;;  %v1489_v2 = vld [vmem:[%s1476_s22] sm:$0xff]  ;;  %v1534_v11 = vld [vmem:[%s1476_s22 + $0x50] sm:$0xff]  ;;  %v1013_v57 = vrot.slane %v1482_v1, 1  ;;  %v1014_v58 = vrot.slane %v1247_v56, 1  ;;  %v1249_v62 = vld [vmem:[%s1476_s22 + $0x68] sm:$0x1] }
  0x13   : > { %354 = vrot.lane.b32.xlu2 %v1489_v2, %s1424_s23  ;;  %v1494_v3 = vld [vmem:[%s1476_s22 + $0xc0] sm:$0xff]  ;;  %v1537_v12 = vld [vmem:[%s1476_s22 + $0x70] sm:$0xff]  ;;  %v1251_v9 = vld [vmem:[%s1476_s22 + $0x88] sm:$0x1] }
  0x14   : > { %v1497_v4 = vld [vmem:[%s1476_s22 + $0xa0] sm:$0xff]  ;;  %v1546_v13 = vld [vmem:[%s1476_s22 + $0x90] sm:$0xff]  ;;  %v1015_v61 = vsel %vm1009_vm2, %v1013_v57, %v1014_v58  ;;  %v1255_v19 = vld [vmem:[%s1476_s22 + $0xc8] sm:$0x1] }
  0x15   : > { %v1500_v5 = vld [vmem:[%s1476_s22 + $0xe0] sm:$0xff]  ;;  %v1549_v14 = vld [vmem:[%s1476_s22 + $0xb0] sm:$0xff]  ;;  %v1026_v21 = vrot.slane %v1255_v19, 1 }
  0x16   : > { %v1509_v6 = vld [vmem:[%s1476_s22 + $0x60] sm:$0xff]  ;;  %v1552_v15 = vld [vmem:[%s1476_s22 + $0xd0] sm:$0xff] }
  0x17   : > { %v1512_v7 = vld [vmem:[%s1476_s22 + $0x20] sm:$0xff]  ;;  %v1561_v16 = vld [vmem:[%s1476_s22 + $0xf0] sm:$0xff]  ;;  %v1016_v63 = vrot.slane %v1509_v6, 1 }
  0x18   : > { %v492_v31 = vld [vmem:[%s1476_s22 + $0x1] sm:$0xff]  ;;  %v1010_v51 = vrot.slane %v1512_v7, 1  ;;  %v1315_v54 = vld [vmem:[%s1476_s22 + $0x11] sm:$0xff] }
  0x19   : > { %366 = vrot.lane.b32.xlu0 %v1494_v3, %s1424_s23  ;;  %v1629_v34 = vld [vmem:[%s1622_s26] sm:$0xff]  ;;  %v1316_v60 = vld [vmem:[%s1476_s22 + $0x31] sm:$0xff] }
  0x1a   : > { %364 = vrot.lane.b32.xlu1 %v1497_v4, %s1424_s23  ;;  %v493_v35 = vld [vmem:[%s1476_s22 + $0x21] sm:$0xff]  ;;  %v1012_v55 = vsel %vm1009_vm2, %v1010_v51, %v1011_v52  ;;  %v1319_v17 = vld [vmem:[%s1476_s22 + $0x91] sm:$0xff] }
  0x1b   : > { %368 = vrot.lane.b32.xlu2 %v1500_v5, %s1424_s23  ;;  %v494_v37 = vld [vmem:[%s1476_s22 + $0x41] sm:$0xff] }
  0x1c   : > { %v495_v39 = vld [vmem:[%s1476_s22 + $0x61] sm:$0xff] }
  0x1d   : > { %v496_v41 = vld [vmem:[%s1476_s22 + $0x81] sm:$0xff] }
  0x1e   : > { %v497_v43 = vld [vmem:[%s1476_s22 + $0xa1] sm:$0xff] }
  0x1f   : > { %v498_v45 = vld [vmem:[%s1476_s22 + $0xc1] sm:$0xff] }
  0x20   : > { %v499_v47 = vld [vmem:[%s1476_s22 + $0xe1] sm:$0xff] }
  0x21   : > { %360 = vrot.lane.b32.xlu0 %v1509_v6, %s1424_s23 }
  0x22   : > { %356 = vrot.lane.b32.xlu1 %v1512_v7, %s1424_s23 }
  0x23   : > { %667 = vrot.lane.b32.xlu2 %v1515_v8, %s1424_s23 }
  0x29   : > { %669 = vrot.lane.b32.xlu0 %v1531_v10, %s1424_s23 }
  0x2a   : > { %671 = vrot.lane.b32.xlu1 %v1534_v11, %s1424_s23 }
  0x2b   : > { %673 = vrot.lane.b32.xlu2 %v1537_v12, %s1424_s23 }
  0x31   : > { %675 = vrot.lane.b32.xlu0 %v1546_v13, %s1424_s23 }
  0x32   : > { %677 = vrot.lane.b32.xlu1 %v1549_v14, %s1424_s23 }
  0x33   : > { %679 = vrot.lane.b32.xlu2 %v1552_v15, %s1424_s23 }
  0x39   : > { %681 = vrot.lane.b32.xlu0 %v1561_v16, %s1424_s23 }
  0x3a   : > { %917 = vrot.lane.b32.xlu1 %v1512_v7, %s1424_s23 }
  0x3b   : > { %919 = vrot.lane.b32.xlu2 %v1482_v1, %s1424_s23 }
  0x41   : > { %921 = vrot.lane.b32.xlu0 %v1509_v6, %s1424_s23 }
  0x42   : > { %923 = vrot.lane.b32.xlu1 %v1479_v0, %s1424_s23 }
  0x43   : > { %925 = vrot.lane.b32.xlu2 %v1497_v4, %s1424_s23 }
  0x49   : > { %927 = vrot.lane.b32.xlu0 %v1494_v3, %s1424_s23 }
  0x4a   : > { %929 = vrot.lane.b32.xlu1 %v1500_v5, %s1424_s23 }
  0x4b   : > { %931 = vrot.lane.b32.xlu2 %v1629_v34, %s1424_s23 }
  0x6d   : > { %v355_v20 = vpop.permute.xlu2 %354 }
  0x6e   : > { %1260 = vmatmul.msk.f32.vlgmr.msra.gmra.mxu0 %vm370_vm1, %v355_v20  ;;  %v1025_v20 = vrot.slane %v1494_v3, 1 }
  0x6f   : > { %1354 = vmatpush.msk.msra.mxu0 %vm387_vm0, %v1353_v26 }
  0x75   : > { %v369_v30 = vpop.permute.xlu2 %368 }
  0x7d   : > { %v668_v36 = vpop.permute.xlu2 %667 }
  0x83   : > { %v363_v24 = vpop.permute.xlu0 %362 }
  0x84   : > { %v359_v25 = vpop.permute.xlu1 %358  ;;  %1264 = vmatmul.msk.f32.vlgmr.msra.gmra.mxu2 %vm370_vm1, %v363_v24  ;;  %v1257_v24 = vld [vmem:[%s1476_s22 + $0xe8] sm:$0x1] }
  0x85   : > { %1262 = vmatmul.msk.f32.vlgmr.msra.gmra.mxu1 %vm370_vm1, %v359_v25  ;;  %1334 = vmatpush.msk.msra.mxu2 %vm387_vm0, %v1333_v22  ;;  %v674_v42 = vpop.permute.xlu2 %673  ;;  %v1320_v22 = vld [vmem:[%s1476_s22 + $0xb1] sm:$0xff]  ;;  %v1028_v25 = vrot.slane %v1500_v5, 1  ;;  %v1029_v26 = vrot.slane %v1257_v24, 1 }
  0x86   : > { %1324 = vmatpush.msk.msra.mxu1 %vm387_vm0, %v1323_v23  ;;  %v1027_v23 = vsel %vm1009_vm2, %v1025_v20, %v1026_v21 }
  0x8b   : > { %v367_v28 = vpop.permute.xlu0 %366 }
  0x8c   : > { %v365_v29 = vpop.permute.xlu1 %364  ;;  %1266 = vmatmul.msk.f32.vlgmr.msra.gmra.mxu3 %vm370_vm1, %v367_v28 }
  0x8d   : > { %1265 = vmatmul.msk.f32.gmra.mxu2 %vm370_vm1, %v365_v29  ;;  %1344 = vmatpush.msk.msra.mxu3 %vm387_vm0, %v1343_v27  ;;  %v680_v48 = vpop.permute.xlu2 %679  ;;  %v1321_v29 = vld [vmem:[%s1476_s22 + $0xd1] sm:$0xff] }
  0x93   : > { %v361_v32 = vpop.permute.xlu0 %360 }
  0x94   : > { %v357_v33 = vpop.permute.xlu1 %356  ;;  %1263 = vmatmul.msk.f32.gmra.mxu1 %vm370_vm1, %v361_v32  ;;  %1267 = vmatmul.msk.f32.gmra.mxu3 %vm370_vm1, %v369_v30  ;;  %v334_v32 = vld [vmem:[%s1622_s26 + $0x8] sm:$0x1] }
  0x95   : > { %1279 = vmatmul.msk.f32.vlgmr.msrb.gmra.mxu2 %vm370_vm1, %v492_v31  ;;  %1261 = vmatmul.msk.f32.gmra.mxu0 %vm370_vm1, %v357_v33  ;;  %v920_v59 = vpop.permute.xlu2 %919  ;;  %v1030_v31 = vsel %vm1009_vm2, %v1028_v25, %v1029_v26  ;;  %v1032_v33 = vrot.slane %v334_v32, 1 }
  0x9b   : > { %v670_v38 = vpop.permute.xlu0 %669 }
  0x9c   : > { %1269 = vmatmul.msk.f32.vlgmr.msrb.gmra.mxu1 %vm370_vm1, %v1489_v2  ;;  %1297 = vmatmul.msk.f32.vlgmr.msrb.gmra.mxu3 %vm370_vm1, %v1515_v8  ;;  %v672_v40 = vpop.permute.xlu1 %671 }
  0x9d   : > { %1280 = vmatmul.msk.f32.gmra.mxu2 %vm370_vm1, %v493_v35  ;;  %1307 = vmatmul.msk.f32.vlgmr.msrb.gmra.mxu0 %vm370_vm1, %v668_v36 }
  0xa3   : > { %v676_v44 = vpop.permute.xlu0 %675 }
  0xa4   : > { %1270 = vmatmul.msk.f32.gmra.mxu1 %vm370_vm1, %v1512_v7  ;;  %1298 = vmatmul.msk.f32.gmra.mxu3 %vm370_vm1, %v1531_v10  ;;  %v678_v46 = vpop.permute.xlu1 %677  ;;  %v1019_v10 = vrot.slane %v1479_v0, 1 }
  0xa5   : > { %1281 = vmatmul.msk.f32.gmra.mxu2 %vm370_vm1, %v494_v37  ;;  %1308 = vmatmul.msk.f32.gmra.mxu0 %vm370_vm1, %v670_v38 }
  0xab   : > { %v682_v49 = vpop.permute.xlu0 %681 }
  0xac   : > { %1271 = vmatmul.msk.f32.gmra.mxu1 %vm370_vm1, %v1482_v1  ;;  %1299 = vmatmul.msk.f32.gmra.mxu3 %vm370_vm1, %v1534_v11  ;;  %v918_v53 = vpop.permute.xlu1 %917 }
  0xad   : > { %1282 = vmatmul.msk.f32.gmra.mxu2 %vm370_vm1, %v495_v39  ;;  %1309 = vmatmul.msk.f32.gmra.mxu0 %vm370_vm1, %v672_v40  ;;  %v1322_v39 = vld [vmem:[%s1476_s22 + $0xf1] sm:$0xff] }
  0xb3   : > { %v922_v2 = vpop.permute.xlu0 %921 }
  0xb4   : > { %1272 = vmatmul.msk.f32.gmra.mxu1 %vm370_vm1, %v1509_v6  ;;  %1300 = vmatmul.msk.f32.gmra.mxu3 %vm370_vm1, %v1537_v12  ;;  %v924_v11 = vpop.permute.xlu1 %923  ;;  %v1318_v12 = vld [vmem:[%s1476_s22 + $0x71] sm:$0xff] }
  0xb5   : > { %1283 = vmatmul.msk.f32.gmra.mxu2 %vm370_vm1, %v496_v41  ;;  %1310 = vmatmul.msk.f32.gmra.mxu0 %vm370_vm1, %v674_v42 }
  0xbc   : > { %1273 = vmatmul.msk.f32.gmra.mxu1 %vm370_vm1, %v1479_v0  ;;  %1301 = vmatmul.msk.f32.gmra.mxu3 %vm370_vm1, %v1546_v13  ;;  %v930_v28 = vpop.permute.xlu1 %929 }
  0xbd   : > { %1284 = vmatmul.msk.f32.gmra.mxu2 %vm370_vm1, %v497_v43  ;;  %1311 = vmatmul.msk.f32.gmra.mxu0 %vm370_vm1, %v676_v44 }
  0xc4   : > { %1274 = vmatmul.msk.f32.gmra.mxu1 %vm370_vm1, %v1497_v4  ;;  %1302 = vmatmul.msk.f32.gmra.mxu3 %vm370_vm1, %v1549_v14  ;;  %v1253_v14 = vld [vmem:[%s1476_s22 + $0xa8] sm:$0x1] }
  0xc5   : > { %1285 = vmatmul.msk.f32.gmra.mxu2 %vm370_vm1, %v498_v45  ;;  %1312 = vmatmul.msk.f32.gmra.mxu0 %vm370_vm1, %v678_v46 }
  0xcc   : > { %1275 = vmatmul.msk.f32.gmra.mxu1 %vm370_vm1, %v1494_v3  ;;  %1303 = vmatmul.msk.f32.gmra.mxu3 %vm370_vm1, %v1552_v15  ;;  %v1022_v15 = vrot.slane %v1497_v4, 1 }
  0xcd   : > { %1286 = vmatmul.msk.f32.gmra.mxu2 %vm370_vm1, %v499_v47  ;;  %1313 = vmatmul.msk.f32.gmra.mxu0 %vm370_vm1, %v680_v48 }
  0xd4   : > { %1276 = vmatmul.msk.f32.gmra.mxu1 %vm370_vm1, %v1500_v5  ;;  %1304 = vmatmul.msk.f32.gmra.mxu3 %vm370_vm1, %v1561_v16  ;;  %v926_v16 = vpop.permute.xlu2 %925 }
  0xd5   : > { %1335 = vmatmul.msk.f32.vlgmr.msra.gmra.mxu2 %vm370_vm1, %v1512_v7  ;;  %1314 = vmatmul.msk.f32.gmra.mxu0 %vm370_vm1, %v682_v49  ;;  %v1317_v7 = vld [vmem:[%s1476_s22 + $0x51] sm:$0xff] }
  0xdc   : > { %1325 = vmatmul.msk.f32.vlgmr.msra.gmra.mxu1 %vm370_vm1, %v1315_v54  ;;  %1345 = vmatmul.msk.f32.vlgmr.msra.gmra.mxu3 %vm370_vm1, %v918_v53  ;;  %v932_v38 = vpop.permute.xlu2 %931 }
  0xdd   : > { %1336 = vmatmul.msk.f32.gmra.mxu2 %vm370_vm1, %v1482_v1  ;;  %1355 = vmatmul.msk.f32.vlgmr.msra.gmra.mxu0 %vm370_vm1, %v1012_v55  ;;  %v1017_v1 = vrot.slane %v1249_v62, 1 }
  0xdf   : > { %v1018_v8 = vsel %vm1009_vm2, %v1016_v63, %v1017_v1 }
  0xe4   : > { %1326 = vmatmul.msk.f32.gmra.mxu1 %vm370_vm1, %v1316_v60  ;;  %1346 = vmatmul.msk.f32.gmra.mxu3 %vm370_vm1, %v920_v59 }
  0xe5   : > { %1337 = vmatmul.msk.f32.gmra.mxu2 %vm370_vm1, %v1509_v6  ;;  %1356 = vmatmul.msk.f32.gmra.mxu0 %vm370_vm1, %v1015_v61  ;;  %v1020_v6 = vrot.slane %v1251_v9, 1 }
  0xe7   : > { %v1021_v13 = vsel %vm1009_vm2, %v1019_v10, %v1020_v6 }
  0xeb   : > { %v408_v30 = vpop.f32.mrf.mxu0 }
  0xec   : > { %1327 = vmatmul.msk.f32.gmra.mxu1 %vm370_vm1, %v1317_v7  ;;  %1347 = vmatmul.msk.f32.gmra.mxu3 %vm370_vm1, %v922_v2 }
  0xed   : > { %1338 = vmatmul.msk.f32.gmra.mxu2 %vm370_vm1, %v1479_v0  ;;  %1357 = vmatmul.msk.f32.gmra.mxu0 %vm370_vm1, %v1018_v8  ;;  %v1023_v0 = vrot.slane %v1253_v14, 1 }
  0xef   : > { %v1024_v18 = vsel %vm1009_vm2, %v1022_v15, %v1023_v0 }
  0xf4   : > { %1328 = vmatmul.msk.f32.gmra.mxu1 %vm370_vm1, %v1318_v12  ;;  %1348 = vmatmul.msk.f32.gmra.mxu3 %vm370_vm1, %v924_v11 }
  0xf5   : > { %1339 = vmatmul.msk.f32.gmra.mxu2 %vm370_vm1, %v1497_v4  ;;  %1358 = vmatmul.msk.f32.gmra.mxu0 %vm370_vm1, %v1021_v13  ;;  %v928_v4 = vpop.permute.xlu0 %927 }
  0xfc   : > { %1329 = vmatmul.msk.f32.gmra.mxu1 %vm370_vm1, %v1319_v17  ;;  %1349 = vmatmul.msk.f32.gmra.mxu3 %vm370_vm1, %v926_v16 }
  0xfd   : > { %1340 = vmatmul.msk.f32.gmra.mxu2 %vm370_vm1, %v1494_v3  ;;  %1359 = vmatmul.msk.f32.gmra.mxu0 %vm370_vm1, %v1024_v18 }
 0x102   : > { %v1747_v27 = vpop.f32.mrf.mxu1 }
 0x104   : > { %1330 = vmatmul.msk.f32.gmra.mxu1 %vm370_vm1, %v1320_v22  ;;  %1350 = vmatmul.msk.f32.gmra.mxu3 %vm370_vm1, %v928_v4 }
 0x105   : > { %1341 = vmatmul.msk.f32.gmra.mxu2 %vm370_vm1, %v1500_v5  ;;  %1360 = vmatmul.msk.f32.gmra.mxu0 %vm370_vm1, %v1027_v23  ;;  %v1031_v5 = vrot.slane %v1629_v34, 1 }
 0x107   : > { %v1745_v3 = vpop.f32.mrf.mxu2  ;;  %v1033_v41 = vsel %vm1009_vm2, %v1031_v5, %v1032_v33 }
 0x10c   : > { %1331 = vmatmul.msk.f32.gmra.mxu1 %vm370_vm1, %v1321_v29  ;;  %1351 = vmatmul.msk.f32.gmra.mxu3 %vm370_vm1, %v930_v28  ;;  %v1808_v29 = vld [vmem:[%s1872_s3] ss:$0 sm:$0xff] }
 0x10d   : > { %1342 = vmatmul.msk.f32.gmra.mxu2 %vm370_vm1, %v1629_v34  ;;  %1361 = vmatmul.msk.f32.gmra.mxu0 %vm370_vm1, %v1030_v31 }
 0x10f   : > { %v1758_v35 = vpop.f32.mrf.mxu3 }
 0x110   : > { %v1760_v36 = vpop.f32.mrf.mxu2 }
 0x111   : > { %v1762_v37 = vpop.f32.mrf.mxu1 }
 0x112   : > { %v411_v40 = vpop.f32.mrf.mxu0 }
 0x114   : > { %1332 = vmatmul.msk.f32.gmra.mxu1 %vm370_vm1, %v1322_v39  ;;  %1352 = vmatmul.msk.f32.gmra.mxu3 %vm370_vm1, %v932_v38 }
 0x115   : > { %1362 = vmatmul.msk.f32.gmra.mxu0 %vm370_vm1, %v1033_v41 }
 0x117   : > { %v1769_v42 = vpop.f32.mrf.mxu3 }
 0x118   : > { %v546_v34 = vpop.f32.mrf.mxu2 }
 0x119   : > { %v468_v43 = vpop.f32.mrf.mxu1 }
 0x11a   : > { %v719_v44 = vpop.f32.mrf.mxu0  ;;  %v469_v10 = vadd.f32 %v468_v43, %v408_v30 }
 0x11c   : > { %v570_v13 = vadd.f32 %v546_v34, %v469_v10 }
 0x11f   : > { %v633_v45 = vpop.f32.mrf.mxu3 }
 0x120   : > { %v549_v46 = vpop.f32.mrf.mxu2  ;;  %v657_v15 = vadd.f32 %v633_v45, %v570_v13 }
 0x121   : > { %v471_v47 = vpop.f32.mrf.mxu1 }
 0x122   : > { %v722_v48 = vpop.f32.mrf.mxu0  ;;  %v472_v0 = vadd.f32 %v471_v47, %v411_v40  ;;  %v743_v17 = vadd.f32 %v719_v44, %v657_v15 }
 0x124   : > { %v571_v20 = vadd.f32 %v549_v46, %v472_v0 }
 0x127   : > { %v636_v49 = vpop.f32.mrf.mxu3 }
 0x128   : > { %v552_v50 = vpop.f32.mrf.mxu2  ;;  %v658_v22 = vadd.f32 %v636_v49, %v571_v20 }
 0x129   : > { %v474_v51 = vpop.f32.mrf.mxu1 }
 0x12a   : > { %v725_v52 = vpop.f32.mrf.mxu0  ;;  %v475_v23 = vadd.f32 %v474_v51, %v1747_v27  ;;  %v744_v26 = vadd.f32 %v722_v48, %v658_v22 }
 0x12c   : > { %v572_v32 = vadd.f32 %v552_v50, %v475_v23 }
 0x12f   : > { %v639_v53 = vpop.f32.mrf.mxu3 }
 0x130   : > { %v555_v54 = vpop.f32.mrf.mxu2  ;;  %v659_v27 = vadd.f32 %v639_v53, %v572_v32 }
 0x131   : > { %v477_v55 = vpop.f32.mrf.mxu1 }
 0x132   : > { %v1771_v56 = vpop.f32.mrf.mxu0  ;;  %v478_v40 = vadd.f32 %v477_v55, %v1762_v37  ;;  %v745_v43 = vadd.f32 %v725_v52, %v659_v27 }
 0x134   : > { %v573_v47 = vadd.f32 %v555_v54, %v478_v40 }
 0x137   : > { %v642_v57 = vpop.f32.mrf.mxu3 }
 0x138   : > { %v1773_v58 = vpop.f32.mrf.mxu2  ;;  %v660_v51 = vadd.f32 %v642_v57, %v573_v47 }
 0x139   : > { %v480_v59 = vpop.f32.mrf.mxu1 }
 0x13a   : > { %v1775_v60 = vpop.f32.mrf.mxu0  ;;  %v481_v10 = vadd.f32 %v480_v59, %v1745_v3  ;;  %v746_v13 = vadd.f32 %v1771_v56, %v660_v51 }
 0x13c   : > { %v574_v54 = vadd.f32 %v1773_v58, %v481_v10 }
 0x13f   : > { %v1777_v61 = vpop.f32.mrf.mxu3 }
 0x140   : > { %v1779_v62 = vpop.f32.mrf.mxu2  ;;  %v661_v57 = vadd.f32 %v1777_v61, %v574_v54 }
 0x141   : > { %v1781_v63 = vpop.f32.mrf.mxu1 }
 0x142   : > { %v1783_v1 = vpop.f32.mrf.mxu0  ;;  %v484_v3 = vadd.f32 %v1781_v63, %v1760_v36 }
 0x144   : > { %v575_v23 = vadd.f32 %v1779_v62, %v484_v3 }
 0x147   : > { %v1785_v2 = vpop.f32.mrf.mxu3 }
 0x148   : > { %v1787_v7 = vpop.f32.mrf.mxu2 }
 0x149   : > { %v1789_v8 = vpop.f32.mrf.mxu1 }
 0x14a   : > { %v1791_v9 = vpop.f32.mrf.mxu0  ;;  %v487_v36 = vadd.f32 %v1789_v8, %v1758_v35 }
 0x14f   : > { %v1793_v6 = vpop.f32.mrf.mxu3 }
 0x150   : > { %v1795_v11 = vpop.f32.mrf.mxu2 }
 0x151   : > { %v1797_v12 = vpop.f32.mrf.mxu1 }
 0x152   : > { %v1799_v14 = vpop.f32.mrf.mxu0  ;;  %v490_v35 = vadd.f32 %v1797_v12, %v1769_v42 }
 0x157   : > { %v1801_v16 = vpop.f32.mrf.mxu3 }
 0x158   : > { %v883_v18 = vpop.f32.mrf.mxu2 }
 0x159   : > { %v805_v19 = vpop.f32.mrf.mxu1 }
 0x15a   : > { %v829_v21 = vadd.f32 %v805_v19, %v743_v17  ;;  %v1072_v4 = vpop.f32.mrf.mxu0 }
 0x15c   : > { %v907_v24 = vadd.f32 %v883_v18, %v829_v21  ;;  %v747_v21 = vadd.f32 %v1775_v60, %v661_v57 }
 0x15f   : > { %v969_v25 = vpop.f32.mrf.mxu3 }
 0x160   : > { %v993_v28 = vadd.f32 %v969_v25, %v907_v24  ;;  %v886_v30 = vpop.f32.mrf.mxu2 }
 0x161   : > { %v808_v31 = vpop.f32.mrf.mxu1 }
 0x162   : > { %v830_v5 = vadd.f32 %v808_v31, %v744_v26  ;;  %v1096_v33 = vadd.f32 %v1072_v4, %v993_v28  ;;  %v1075_v38 = vpop.f32.mrf.mxu0  ;;  %v662_v26 = vadd.f32 %v1785_v2, %v575_v23 }
 0x164   : > { %v1108_v39 = vadd.f32 %v1808_v29, %v1096_v33  ;;  %v908_v41 = vadd.f32 %v886_v30, %v830_v5  ;;  %v748_v30 = vadd.f32 %v1783_v1, %v662_v26  ;;  %v576_v5 = vadd.f32 %v1787_v7, %v487_v36 }
 0x166   : > { %1116 = vst.msk [vmem:[%s1813_s29] sm:$0xff] %vm370_vm1, %v1108_v39  ;;  %v663_v27 = vadd.f32 %v1793_v6, %v576_v5 }
 0x167   : > { %v972_v34 = vpop.f32.mrf.mxu3 }
 0x168   : > { %v994_v44 = vadd.f32 %v972_v34, %v908_v41  ;;  %v889_v45 = vpop.f32.mrf.mxu2  ;;  %v749_v40 = vadd.f32 %v1791_v9, %v663_v27 }
 0x169   : > { %v811_v46 = vpop.f32.mrf.mxu1 }
 0x16a   : > { %v831_v48 = vadd.f32 %v811_v46, %v745_v43  ;;  %v1097_v49 = vadd.f32 %v1075_v38, %v994_v44  ;;  %v1078_v50 = vpop.f32.mrf.mxu0  ;;  %v577_v43 = vadd.f32 %v1795_v11, %v490_v35 }
 0x16c   : > { %v1109_v53 = vadd.f32 %v1808_v29, %v1097_v49  ;;  %v909_v37 = vadd.f32 %v889_v45, %v831_v48  ;;  %v664_v45 = vadd.f32 %v1801_v16, %v577_v43 }
 0x16e   : > { %1117 = vst.msk [vmem:[%s1813_s29 + $0x8] sm:$0xff] %vm370_vm1, %v1109_v53  ;;  %v750_v9 = vadd.f32 %v1799_v14, %v664_v45 }
 0x16f   : > { %v975_v55 = vpop.f32.mrf.mxu3 }
 0x170   : > { %v995_v52 = vadd.f32 %v975_v55, %v909_v37  ;;  %v892_v15 = vpop.f32.mrf.mxu2 }
 0x171   : > { %v814_v0 = vpop.f32.mrf.mxu1 }
 0x172   : > { %v832_v17 = vadd.f32 %v814_v0, %v746_v13  ;;  %v1098_v18 = vadd.f32 %v1078_v50, %v995_v52  ;;  %v1081_v19 = vpop.f32.mrf.mxu0 }
 0x174   : > { %v1110_v20 = vadd.f32 %v1808_v29, %v1098_v18  ;;  %v910_v59 = vadd.f32 %v892_v15, %v832_v17 }
 0x176   : > { %1118 = vst.msk [vmem:[%s1813_s29 + $0x10] sm:$0xff] %vm370_vm1, %v1110_v20 }
 0x177   : > { %v978_v56 = vpop.f32.mrf.mxu3 }
 0x178   : > { %v996_v4 = vadd.f32 %v978_v56, %v910_v59  ;;  %v895_v22 = vpop.f32.mrf.mxu2 }
 0x179   : > { %v817_v58 = vpop.f32.mrf.mxu1 }
 0x17a   : > { %v833_v24 = vadd.f32 %v817_v58, %v747_v21  ;;  %v1099_v25 = vadd.f32 %v1081_v19, %v996_v4  ;;  %v1084_v61 = vpop.f32.mrf.mxu0 }
 0x17c   : > { %v1111_v28 = vadd.f32 %v1808_v29, %v1099_v25  ;;  %v911_v63 = vadd.f32 %v895_v22, %v833_v24 }
 0x17e   : > { %1119 = vst.msk [vmem:[%s1813_s29 + $0x18] sm:$0xff] %vm370_vm1, %v1111_v28 }
 0x17f   : > { %v981_v60 = vpop.f32.mrf.mxu3 }
 0x180   : > { %v997_v31 = vadd.f32 %v981_v60, %v911_v63  ;;  %v898_v32 = vpop.f32.mrf.mxu2 }
 0x181   : > { %v820_v62 = vpop.f32.mrf.mxu1 }
 0x182   : > { %v834_v33 = vadd.f32 %v820_v62, %v748_v30  ;;  %v1100_v38 = vadd.f32 %v1084_v61, %v997_v31  ;;  %v1087_v2 = vpop.f32.mrf.mxu0 }
 0x184   : > { %v1112_v39 = vadd.f32 %v1808_v29, %v1100_v38  ;;  %v912_v8 = vadd.f32 %v898_v32, %v834_v33 }
 0x186   : > { %1120 = vst.msk [vmem:[%s1813_s29 + $0x20] sm:$0xff] %vm370_vm1, %v1112_v39 }
 0x187   : > { %v984_v1 = vpop.f32.mrf.mxu3 }
 0x188   : > { %v998_v41 = vadd.f32 %v984_v1, %v912_v8  ;;  %v901_v7 = vpop.f32.mrf.mxu2 }
 0x189   : > { %v823_v34 = vpop.f32.mrf.mxu1 }
 0x18a   : > { %v835_v44 = vadd.f32 %v823_v34, %v749_v40  ;;  %v1101_v6 = vadd.f32 %v1087_v2, %v998_v41  ;;  %v1090_v47 = vpop.f32.mrf.mxu0 }
 0x18c   : > { %v1113_v46 = vadd.f32 %v1808_v29, %v1101_v6  ;;  %v913_v42 = vadd.f32 %v901_v7, %v835_v44 }
 0x18e   : > { %1121 = vst.msk [vmem:[%s1813_s29 + $0x28] sm:$0xff] %vm370_vm1, %v1113_v46 }
 0x18f   : > { %v987_v12 = vpop.f32.mrf.mxu3 }
 0x190   : > { %v999_v48 = vadd.f32 %v987_v12, %v913_v42  ;;  %v904_v11 = vpop.f32.mrf.mxu2 }
 0x191   : > { %v826_v49 = vpop.f32.mrf.mxu1 }
 0x192   : > { %v836_v50 = vadd.f32 %v826_v49, %v750_v9  ;;  %v1102_v51 = vadd.f32 %v1090_v47, %v999_v48  ;;  %v1093_v37 = vpop.f32.mrf.mxu0 }
 0x194   : > { %v1114_v53 = vadd.f32 %v1808_v29, %v1102_v51  ;;  %v914_v16 = vadd.f32 %v904_v11, %v836_v50 }
 0x196   : > { %1122 = vst.msk [vmem:[%s1813_s29 + $0x30] sm:$0xff] %vm370_vm1, %v1114_v53 }
 0x197   : > { %v990_v10 = vpop.f32.mrf.mxu3 }
 0x198   : > { %v1000_v55 = vadd.f32 %v990_v10, %v914_v16 }
 0x19a   : > { %v1103_v13 = vadd.f32 %v1093_v37, %v1000_v55 }
 0x19c   : > { %v1115_v52 = vadd.f32 %v1808_v29, %v1103_v13 }
 0x19e   : > { %1123 = vst.msk [vmem:[%s1813_s29 + $0x38] sm:$0xff] %vm370_vm1, %v1115_v52 }
 0x19f PF: > { %s14_s17 = sadd.s32 1, %s1422_s17   ;;  %s1874_s15 = smov %s1418_s16 }
 0x1a0   : > { %p11_p5 = scmp.ge.s32.totalorder %s14_s17, 4   ;;  %s1875_s16 = smov %s1877_s18 }
 0x1a2   :  { %13 = sbr.rel (!%p11_p5) target bundleno = 2 (0x2), region = 79 }

</bundles_post_ra>
